<compile_context>
chip_gen: v7x
topology: tpu7x:2x2x1
jax: 0.10.0
libtpu: 0.0.40
codegen_flags: <defaults>
</compile_context>

<pallas_src>
import numpy as np
import jax
import jax.numpy as jnp
from jax import lax
from jax.experimental import pallas as pl
from jax.experimental.pallas import tpu as pltpu


def _round_up(x, m):
    return (x + m - 1) // m * m


# ----------------------------------------------------------------------------
# Pallas kernel: fused MLP over the concatenated (p|q|r) embedding tile
# ----------------------------------------------------------------------------
def _make_kernel(n_hidden, tb, sub):
    """Fused-MLP kernel for a fixed (static) layer stack and tile geometry."""
    n_sub = tb // sub

    def kernel(*refs):
        x_ref = refs[0]          # (tb, kin_pad)   bf16, lane-dense (kin_pad % 128 == 0)
        out_ref = refs[-1]       # (tb, 128)       f32,  lane-dense; column 0 is the result
        w_refs = refs[1:-1]

        def compute(x):
            # x: (sub, kin_pad) bf16
            if n_hidden == 0:
                # arch == []  ->  single Linear(3D, 1, bias=False); weight padded to
                # (kin_pad, 128) with zeros so the output block is lane-dense.
                return jnp.dot(x, w_refs[0][...], preferred_element_type=jnp.float32)

            w0_ref, b0_ref = w_refs[0], w_refs[1]
            h = jnp.dot(x, w0_ref[...], preferred_element_type=jnp.float32)
            h = jnp.maximum(h + b0_ref[...], 0.0)

            k = 2
            for _ in range(n_hidden - 1):
                w_ref, b_ref = w_refs[k], w_refs[k + 1]
                k += 2
                h = jnp.dot(h.astype(jnp.bfloat16), w_ref[...],
                            preferred_element_type=jnp.float32)
                h = jnp.maximum(h + b_ref[...], 0.0)

            # Final bias-free layer, zero-padded to 128 output lanes.
            w_out_ref = w_refs[k]
            return jnp.dot(h.astype(jnp.bfloat16), w_out_ref[...],
                           preferred_element_type=jnp.float32)

        if n_sub == 1:
            out_ref[...] = compute(x_ref[...]).astype(out_ref.dtype)
        else:
            # Bound live vregs for big batch tiles: process `sub` rows at a time.
            def body(ci, carry):
                r0 = pl.multiple_of(ci * sub, sub)
                out_ref[pl.ds(r0, sub), :] = compute(
                    x_ref[pl.ds(r0, sub), :]).astype(out_ref.dtype)
                return carry
            lax.fori_loop(0, n_sub, body, 0, unroll=True)

    return kernel


# ----------------------------------------------------------------------------
# Wrapper
# ----------------------------------------------------------------------------
def nas_triple_forward(params, ps, qs, rs, reg, tb=2048, sub=512):
    d = params['P'].shape[1]

    # Embedding lookup (data-dependent gather) — glue in plain JAX.
    p_emb = params['P'][ps]
    q_emb = params['Q'][qs]
    r_emb = params['R'][rs]
    B = p_emb.shape[0]

    fc_w, fc_b = params['fc_w'], params['fc_b']
    n_hidden = len(fc_b)

    kin = 3 * d
    kin_pad = _round_up(kin, 128)            # lane-dense contraction dim

    # --- batch tile selection -------------------------------------------------
    Bp8 = _round_up(B, 8)
    tb = min(_round_up(tb, 8), Bp8)
    if tb >= Bp8 and Bp8 >= 16:
        # Whole batch would fit in one tile: split into 2 so v7x megacore
        # ("parallel" grid axis) has >=2 iterations to shard across its 2 TCs.
        tb = _round_up(Bp8 // 2, 8)
    Bp = _round_up(B, tb)
    sub = sub if (sub <= tb and tb % sub == 0) else tb

    # --- pack activations: single lane-dense concat, bf16 at the boundary ------
    x = jnp.concatenate([p_emb, q_emb, r_emb], axis=-1)          # (B, 3D)
    x = jnp.pad(x, ((0, Bp - B), (0, kin_pad - kin))).astype(jnp.bfloat16)

    # --- pack weights -----------------------------------------------------------
    weight_inputs = []
    if n_hidden == 0:
        # Linear(3D, 1, bias=False): pad K rows to kin_pad, out cols to 128.
        w_final = fc_w[0]                                        # (3D, 1)
        w_final = jnp.pad(w_final, ((0, kin_pad - kin), (0, 128 - w_final.shape[1])))
        weight_inputs.append(w_final.astype(jnp.bfloat16))
    else:
        w0 = jnp.pad(fc_w[0], ((0, kin_pad - kin), (0, 0)))      # (kin_pad, a0)
        weight_inputs.append(w0.astype(jnp.bfloat16))
        weight_inputs.append(fc_b[0].reshape(1, -1).astype(jnp.float32))
        for i in range(1, n_hidden):
            weight_inputs.append(fc_w[i].astype(jnp.bfloat16))
            weight_inputs.append(fc_b[i].reshape(1, -1).astype(jnp.float32))
        w_out = fc_w[-1]                                         # (a_last, 1), no bias
        w_out = jnp.pad(w_out, ((0, 0), (0, 128 - w_out.shape[1])))
        weight_inputs.append(w_out.astype(jnp.bfloat16))

    x_spec = pl.BlockSpec((tb, kin_pad), lambda i: (i, 0))
    w_specs = [pl.BlockSpec(w.shape, lambda i: (0, 0)) for w in weight_inputs]

    out = pl.pallas_call(
        _make_kernel(n_hidden, tb, sub),
        grid=(Bp // tb,),
        in_specs=[x_spec] + w_specs,
        out_specs=pl.BlockSpec((tb, 128), lambda i: (i, 0)),      # lane-dense store
        out_shape=jax.ShapeDtypeStruct((Bp, 128), jnp.float32),
        compiler_params=pltpu.CompilerParams(
            dimension_semantics=("parallel",)),                   # no cross-grid state
    )(x, *weight_inputs)

    inferences = out[:B, :1]

    # Frobenius norms of the gathered embeddings, computed in the wrapper in f32
    # (keeps cross-grid accumulators out of the kernel).
    regs = reg * (jnp.sqrt(jnp.sum(p_emb * p_emb))
                  + jnp.sqrt(jnp.sum(q_emb * q_emb))
                  + jnp.sqrt(jnp.sum(r_emb * r_emb)))
    return inferences, regs


# ----------------------------------------------------------------------------
# Deterministic parameter init (shapes mirror NAS_Triple.__init__)
# ----------------------------------------------------------------------------
def init_params(key, num_ps, num_qs, num_rs, d, arch):
    n = len(arch)
    keys = jax.random.split(key, 3 + 2 * n + 1)

    params = {}
    # nn.Embedding default init: N(0, 1)
    params['P'] = jax.random.normal(keys[0], (num_ps, d), jnp.float32)
    params['Q'] = jax.random.normal(keys[1], (num_qs, d), jnp.float32)
    params['R'] = jax.random.normal(keys[2], (num_rs, d), jnp.float32)

    # FC stack: Linear(3D, arch0)+ReLU, Linear(arch[i-1], arch[i])+ReLU, ...,
    # Linear(arch[-1], 1, bias=False).  (If arch == []: Linear(3D, 1, bias=False).)
    fc_w, fc_b = [], []
    in_dim = 3 * d
    ki = 3
    for a in arch:
        bound = 1.0 / np.sqrt(in_dim)
        fc_w.append(jax.random.uniform(keys[ki], (in_dim, a), jnp.float32, -bound, bound))
        ki += 1
        fc_b.append(jax.random.uniform(keys[ki], (a,), jnp.float32, -bound, bound))
        ki += 1
        in_dim = a
    bound = 1.0 / np.sqrt(in_dim)
    fc_w.append(jax.random.uniform(keys[ki], (in_dim, 1), jnp.float32, -bound, bound))

    params['fc_w'] = fc_w
    params['fc_b'] = fc_b
    return params


# ----------------------------------------------------------------------------
# Pure-JAX reference (mirrors the torch forward) for verification
# ----------------------------------------------------------------------------
def reference_forward(params, ps, qs, rs, reg):
    p_emb = params['P'][ps]
    q_emb = params['Q'][qs]
    r_emb = params['R'][rs]
    h = jnp.concatenate([p_emb, q_emb, r_emb], axis=-1)

    fc_w, fc_b = params['fc_w'], params['fc_b']
    for i, b in enumerate(fc_b):
        h = jnp.maximum(jnp.dot(h, fc_w[i], preferred_element_type=jnp.float32) + b, 0.0)
    out = jnp.dot(h, fc_w[-1], preferred_element_type=jnp.float32)

    regs = reg * (jnp.linalg.norm(p_emb) + jnp.linalg.norm(q_emb)
                  + jnp.linalg.norm(r_emb))
    return out, regs


if __name__ == "__main__":
    num_ps = num_qs = num_rs = 24
    D = 32
    B = 256
    reg = 0.01

    key = jax.random.PRNGKey(0)
    k_params, k_p, k_q, k_r = jax.random.split(key, 4)

    ps = jax.random.randint(k_p, (B,), 0, num_ps, dtype=jnp.int32)
    qs = jax.random.randint(k_q, (B,), 0, num_qs, dtype=jnp.int32)
    rs = jax.random.randint(k_r, (B,), 0, num_rs, dtype=jnp.int32)

    # --- case 1: hidden MLP arch = (64, 32) -----------------------------------
    arch = (64, 32)
    params = init_params(k_params, num_ps, num_qs, num_rs, D, arch)

    out, regs = nas_triple_forward(params, ps, qs, rs, reg)
    out, regs = jax.block_until_ready((out, regs))

    ref_out, ref_regs = reference_forward(params, ps, qs, rs, reg)
    assert out.shape == (B, 1)
    # bf16 operands on the MXU (same as default-precision f32 dots) -> modest tolerance.
    assert np.allclose(np.asarray(out), np.asarray(ref_out), rtol=2e-2, atol=2e-2)
    assert np.allclose(float(regs), float(ref_regs), rtol=1e-4, atol=1e-4)

    # --- case 2: empty arch -> single bias-free Linear(3D, 1) ------------------
    arch0 = ()
    params0 = init_params(k_params, num_ps, num_qs, num_rs, D, arch0)

    out0, regs0 = nas_triple_forward(params0, ps, qs, rs, reg)
    out0, regs0 = jax.block_until_ready((out0, regs0))

    ref_out0, ref_regs0 = reference_forward(params0, ps, qs, rs, reg)
    assert out0.shape == (B, 1)
    assert np.allclose(np.asarray(out0), np.asarray(ref_out0), rtol=2e-2, atol=2e-2)
    assert np.allclose(float(regs0), float(ref_regs0), rtol=1e-4, atol=1e-4)

    print("KERNEL_OK")
</pallas_src>

<mosaic_0001>
module attributes {stable_mosaic.version = 11 : i64} {
  func.func @kernel(%arg0: i32, %arg1: memref<128x128xbf16, #tpu.memory_space<vmem>>, %arg2: memref<128x64xbf16, #tpu.memory_space<vmem>>, %arg3: memref<1x64xf32, #tpu.memory_space<vmem>>, %arg4: memref<64x32xbf16, #tpu.memory_space<vmem>>, %arg5: memref<1x32xf32, #tpu.memory_space<vmem>>, %arg6: memref<32x128xbf16, #tpu.memory_space<vmem>>, %arg7: memref<128x128xf32, #tpu.memory_space<vmem>>) attributes {dimension_semantics = [#tpu.dimension_semantics<parallel>], iteration_bounds = array<i64: 2>, scalar_prefetch = 0 : i64, scratch_operands = 0 : i64, tpu.core_type = #tpu.core_type<tc>, window_params = [{transform_indices = @transform_0, window_bounds = array<i64: 128, 128>}, {pipeline_mode = #tpu.pipeline_mode<synchronous>, transform_indices = @transform_1, window_bounds = array<i64: 128, 64>}, {pipeline_mode = #tpu.pipeline_mode<synchronous>, transform_indices = @transform_2, window_bounds = array<i64: 1, 64>}, {pipeline_mode = #tpu.pipeline_mode<synchronous>, transform_indices = @transform_3, window_bounds = array<i64: 64, 32>}, {pipeline_mode = #tpu.pipeline_mode<synchronous>, transform_indices = @transform_4, window_bounds = array<i64: 1, 32>}, {pipeline_mode = #tpu.pipeline_mode<synchronous>, transform_indices = @transform_5, window_bounds = array<i64: 32, 128>}, {transform_indices = @transform_6, window_bounds = array<i64: 128, 128>}]} {
    %c0 = arith.constant 0 : index
    %c0_0 = arith.constant 0 : index
    %0 = vector.load %arg1[%c0, %c0_0] : memref<128x128xbf16, #tpu.memory_space<vmem>>, vector<128x128xbf16>
    %c0_1 = arith.constant 0 : index
    %c0_2 = arith.constant 0 : index
    %1 = vector.load %arg2[%c0_1, %c0_2] : memref<128x64xbf16, #tpu.memory_space<vmem>>, vector<128x64xbf16>
    %cst = arith.constant dense<0.000000e+00> : vector<128x64xf32>
    %2 = tpu.matmul %0, %1, %cst {dimension_numbers = #tpu.dot_dimension_numbers<[1], [0], [0], [1], [0, 0, 1, 1], [], []>} : vector<128x128xbf16>, vector<128x64xbf16>, vector<128x64xf32> -> vector<128x64xf32>
    %c0_3 = arith.constant 0 : index
    %c0_4 = arith.constant 0 : index
    %3 = vector.load %arg3[%c0_3, %c0_4] : memref<1x64xf32, #tpu.memory_space<vmem>>, vector<1x64xf32>
    %4 = vector.broadcast %3 : vector<1x64xf32> to vector<128x64xf32>
    %5 = arith.addf %2, %4 : vector<128x64xf32>
    %cst_5 = arith.constant 0.000000e+00 : f32
    %6 = vector.broadcast %cst_5 : f32 to vector<128x64xf32>
    %7 = arith.maximumf %5, %6 : vector<128x64xf32>
    %8 = arith.truncf %7 : vector<128x64xf32> to vector<128x64xbf16>
    %c0_6 = arith.constant 0 : index
    %c0_7 = arith.constant 0 : index
    %9 = vector.load %arg4[%c0_6, %c0_7] : memref<64x32xbf16, #tpu.memory_space<vmem>>, vector<64x32xbf16>
    %cst_8 = arith.constant dense<0.000000e+00> : vector<128x32xf32>
    %10 = tpu.matmul %8, %9, %cst_8 {dimension_numbers = #tpu.dot_dimension_numbers<[1], [0], [0], [1], [0, 0, 1, 1], [], []>} : vector<128x64xbf16>, vector<64x32xbf16>, vector<128x32xf32> -> vector<128x32xf32>
    %c0_9 = arith.constant 0 : index
    %c0_10 = arith.constant 0 : index
    %11 = vector.load %arg5[%c0_9, %c0_10] : memref<1x32xf32, #tpu.memory_space<vmem>>, vector<1x32xf32>
    %12 = vector.broadcast %11 : vector<1x32xf32> to vector<128x32xf32>
    %13 = arith.addf %10, %12 : vector<128x32xf32>
    %cst_11 = arith.constant 0.000000e+00 : f32
    %14 = vector.broadcast %cst_11 : f32 to vector<128x32xf32>
    %15 = arith.maximumf %13, %14 : vector<128x32xf32>
    %16 = arith.truncf %15 : vector<128x32xf32> to vector<128x32xbf16>
    %c0_12 = arith.constant 0 : index
    %c0_13 = arith.constant 0 : index
    %17 = vector.load %arg6[%c0_12, %c0_13] : memref<32x128xbf16, #tpu.memory_space<vmem>>, vector<32x128xbf16>
    %cst_14 = arith.constant dense<0.000000e+00> : vector<128x128xf32>
    %18 = tpu.matmul %16, %17, %cst_14 {dimension_numbers = #tpu.dot_dimension_numbers<[1], [0], [0], [1], [0, 0, 1, 1], [], []>} : vector<128x32xbf16>, vector<32x128xbf16>, vector<128x128xf32> -> vector<128x128xf32>
    %c0_15 = arith.constant 0 : index
    %c0_16 = arith.constant 0 : index
    %19 = vector.load %arg7[%c0_15, %c0_16] : memref<128x128xf32, #tpu.memory_space<vmem>>, vector<128x128xf32>
    tpu.vector_store %arg7[%c0_15, %c0_16], %18 {strides = array<i32>} : memref<128x128xf32, #tpu.memory_space<vmem>>, vector<128x128xf32>,
    return
  }
  func.func @transform_0(%arg0: i32) -> (i32, i32) {
    %c0_i32 = arith.constant 0 : i32
    %c0_i32_0 = arith.constant 0 : i32
    return %arg0, %c0_i32 : i32, i32
  }
  func.func @transform_1(%arg0: i32) -> (i32, i32) {
    %c0_i32 = arith.constant 0 : i32
    %c0_i32_0 = arith.constant 0 : i32
    %c0_i32_1 = arith.constant 0 : i32
    return %c0_i32, %c0_i32_0 : i32, i32
  }
  func.func @transform_2(%arg0: i32) -> (i32, i32) {
    %c0_i32 = arith.constant 0 : i32
    %c0_i32_0 = arith.constant 0 : i32
    %c0_i32_1 = arith.constant 0 : i32
    return %c0_i32, %c0_i32_0 : i32, i32
  }
  func.func @transform_3(%arg0: i32) -> (i32, i32) {
    %c0_i32 = arith.constant 0 : i32
    %c0_i32_0 = arith.constant 0 : i32
    %c0_i32_1 = arith.constant 0 : i32
    return %c0_i32, %c0_i32_0 : i32, i32
  }
  func.func @transform_4(%arg0: i32) -> (i32, i32) {
    %c0_i32 = arith.constant 0 : i32
    %c0_i32_0 = arith.constant 0 : i32
    %c0_i32_1 = arith.constant 0 : i32
    return %c0_i32, %c0_i32_0 : i32, i32
  }
  func.func @transform_5(%arg0: i32) -> (i32, i32) {
    %c0_i32 = arith.constant 0 : i32
    %c0_i32_0 = arith.constant 0 : i32
    %c0_i32_1 = arith.constant 0 : i32
    return %c0_i32, %c0_i32_0 : i32, i32
  }
  func.func @transform_6(%arg0: i32) -> (i32, i32) {
    %c0_i32 = arith.constant 0 : i32
    %c0_i32_0 = arith.constant 0 : i32
    return %arg0, %c0_i32 : i32, i32
  }
}

</mosaic_0001>

<bundles_post_ra>
// kernel: tpu_custom_call.1
= control target key start
LH: loop header
LB: loop body
LE: loop exit
PB: predicated region body
PF: predicated region fallthrough
CT: control target
= control target key end

     0   :  { %11 = vsyncpa [#allocation3], 0  ;;  %s1464_s0 = inlined_call_operand.vmem [shape: bf16[256,128], index: 0, kind: input, shape index: {}]   ;;  %s1465_s1 = inlined_call_operand.vmem [shape: bf16[128,64], index: 1, kind: input, shape index: {}]   ;;  %s1466_s2 = inlined_call_operand.vmem [shape: f32[1,64], index: 2, kind: input, shape index: {}]   ;;  %s1467_s3 = inlined_call_operand.vmem [shape: bf16[64,32], index: 3, kind: input, shape index: {}]   ;;  %s1468_s4 = inlined_call_operand.vmem [shape: f32[1,32], index: 4, kind: input, shape index: {}]   ;;  %s1469_s5 = inlined_call_operand.vmem [shape: bf16[32,128], index: 5, kind: input, shape index: {}]   ;;  %s1470_s6 = inlined_call_operand.hbm [shape: f32[256,128], index: 6, kind: output, shape index: {}]  }
   0x1   :  { %13 = vsyncpa [#allocation3 + $0x1], 0  ;;  %s1265_s21 = smov 0   ;;  %s1267_s22 = smov 0  }
   0x2   :  { %s1269_s23 = smov 0   ;;  %s1271_s24 = smov 0  }
   0x3 LB: > { %s1286_s25 = sadd.s32 4294967295, %s1225_s24   ;;  %s925_s26 = sadd.s32 4294967294, %s1225_s24   ;;  %s1225_s24 = sphi %s1271_s24, %s1476_s24   ;;  %s1221_s23 = sphi %s1269_s23, %s1475_s23   ;;  %s1217_s22 = sphi %s1267_s22, %s1474_s22   ;;  %s1213_s21 = sphi %s1265_s21, %s1473_s21  }
   0x4   : > { %s1290_s27 = sadd.s32 1, %s1225_s24   ;;  %s157_s28 = sadd.s32 1, %s1221_s23 }
   0x5   : > { %s154_s29 = ssub.s32 %s1225_s24, %s1290_s27  ;;  %p167_p0 = scmp.ne.s32.totalorder %s1221_s23, %s1217_s22 }
   0x6   : > { %p155_p1 = scmp.eq.s32.totalorder %s154_s29, 0  ;;  %p168_p2 = scmp.eq.s32.totalorder %s1286_s25, 1 }
   0x7   : > { %p173_p3 = scmp.ne.s32.totalorder %s1217_s22, %s1213_s21  ;;  %p174_p4 = scmp.eq.s32.totalorder %s925_s26, 1 }
   0x8   : > { %s1301_s30 = scalar_select %p155_p1, %s1221_s23, %s157_s28  }
   0x9   : > { %p1303_p5 = por %p168_p2, %p167_p0  ;;  %p1307_p6 = por %p174_p4, %p173_p3 }
   0xa   : > { %p928_p7 = scmp.ge.s32.totalorder %s1225_s24, 1  ;;  %p216_p8 = scmp.lt.s32.totalorder %s1225_s24, 3 }
   0xc   : > { %p217_p9 = pnand %p928_p7, %p216_p8 }
   0xd   : > { %v1141_v0 = vld [vmem:[%s1465_s1] sm:$0xff] (!%p217_p9)   ;;  %s930_s11 = sshll.u32 (!%p217_p9), %s1286_s25, 4  ;;  %v1142_v1 = vld [vmem:[%s1465_s1 + $0x8] sm:$0xff] (!%p217_p9)   ;;  %v1143_v2 = vld [vmem:[%s1465_s1 + $0x10] sm:$0xff] (!%p217_p9)   ;;  %vm549_vm0 = vcmask (!%p217_p9), 523264   ;;  %vm711_vm1 = vcmask (!%p217_p9), 261120  }
   0xe   : > { %220 = sbr.rel (%p217_p9) target bundleno = 744 (0x2e8), region = 44  ;;  %p247_p10 = scmp.lt.s32.totalorder (!%p217_p9), %s930_s11, 31  ;;  %1016 = vmatprep.subr.bf16.mxu0 (!%p217_p9), %v1141_v0  ;;  %v1144_v3 = vld [vmem:[%s1465_s1 + $0x18] sm:$0xff] (!%p217_p9)   ;;  %v1145_v5 = vld [vmem:[%s1465_s1 + $0x20] sm:$0xff] (!%p217_p9)   ;;  %v1146_v6 = vld [vmem:[%s1465_s1 + $0x28] sm:$0xff] (!%p217_p9)  }
   0xf   : > { %1017 = vmatpush3.bf16.msra.mxu0 (!%p217_p9), %v1141_v0  ;;  %v1157_v7 = vld [vmem:[%s1467_s3] sm:$0xff] (!%p217_p9)   ;;  %v1147_v8 = vld [vmem:[%s1465_s1 + $0x30] sm:$0xff] (!%p217_p9)   ;;  %v1158_v9 = vld [vmem:[%s1467_s3 + $0x8] sm:$0xff] (!%p217_p9)   ;;  %s977_s20 = sshll.u32 (!%p217_p9), %s1286_s25, 11 }
  0x10   : > { %1018 = vmatprep.subr.bf16.mxu0 (!%p217_p9), %v1142_v1  ;;  %1092 = vmatprep.subr.bf16.mxu1 (!%p217_p9), %v1157_v7  ;;  %v1159_v10 = vld [vmem:[%s1467_s3 + $0x10] sm:$0xff] (!%p217_p9)   ;;  %v1148_v11 = vld [vmem:[%s1465_s1 + $0x38] sm:$0xff] (!%p217_p9)   ;;  %v1161_v20 = vld [vmem:[%s1469_s5] sm:$0xff] (!%p217_p9)   ;;  %s1414_s9 = scalar_lea.hbm (!%p217_p9), %s1470_s6, %s977_s20 }
  0x11   : > { %1096 = vmatpush3.bf16.msra.mxu1 (!%p217_p9), %v1157_v7  ;;  %v1160_v19 = vld [vmem:[%s1467_s3 + $0x18] sm:$0xff] (!%p217_p9)   ;;  %v932_v21 = vld [vmem:[%s1466_s2] ss:$0 sm:$0xff] (!%p217_p9)  ;;  %v1162_v53 = vld [vmem:[%s1469_s5 + $0x8] sm:$0xff] (!%p217_p9)  }
  0x12   : > { %1093 = vmatprep.subr.bf16.mxu1 (!%p217_p9), %v1158_v9 }
  0x13   : > { %1019 = vmatpush3.bf16.msra.mxu0 (!%p217_p9), %v1142_v1 }
  0x14   : > { %1020 = vmatprep.subr.bf16.mxu0 (!%p217_p9), %v1143_v2 }
  0x15   : > { %s1478_s11 = smov (!%p247_p10, %s930_s11), 31  ;;  %1097 = vmatpush3.bf16.msra.mxu1 %v1158_v9 }
  0x16   : > { %s931_s16 = sshll.u32 %s1478_s11, 2  ;;  %1094 = vmatprep.subr.bf16.mxu1 %v1159_v10  ;;  %s1227_s11 = smov [#allocation2]  }
  0x17   : > { %s1326_s19 = scalar_lea.vmem %s1464_s0, %s931_s16  ;;  %1021 = vmatpush3.bf16.msra.mxu0 %v1143_v2  ;;  %s243_s16 = sand.u32 1, %s1217_s22  }
  0x18   : > { %v1149_v4 = vld [vmem:[%s1326_s19] sm:$0xff]   ;;  %1022 = vmatprep.subr.bf16.mxu0 %v1144_v3  ;;  %v1150_v12 = vld [vmem:[%s1326_s19 + $0x8] sm:$0xff]   ;;  %v1151_v13 = vld [vmem:[%s1326_s19 + $0x10] sm:$0xff]   ;;  %s929_s17 = sshll.u32 %s243_s16, 7  ;;  %s1423_s25 = scalar_lea.sflag [#allocation3], %s243_s16 }
  0x19   : > { %1032 = vmatprep.mubr.bf16.mxu0 %v1149_v4  ;;  %1098 = vmatpush3.bf16.msra.mxu1 %v1159_v10  ;;  %v1152_v14 = vld [vmem:[%s1326_s19 + $0x18] sm:$0xff]   ;;  %v1153_v15 = vld [vmem:[%s1326_s19 + $0x20] sm:$0xff]   ;;  %v1154_v16 = vld [vmem:[%s1326_s19 + $0x28] sm:$0xff]   ;;  %s1394_s18 = scalar_lea.vmem [#allocation2], %s929_s17  ;;  %s1167_s12 = sshll.u32 %s1227_s11, 4  ;;  %s1168_s12 = int_to_ptr.vmem [resolvable:$false] %s1167_s12 }
  0x1a   : > { %v1155_v17 = vld [vmem:[%s1326_s19 + $0x30] sm:$0xff]   ;;  %v1156_v18 = vld [vmem:[%s1326_s19 + $0x38] sm:$0xff]   ;;  %1095 = vmatprep.subr.bf16.mxu1 %v1160_v19  ;;  %s863_s26 = sshll.u32 %s1394_s18, 4  ;;  %s1169_s19 = scalar_lea.vmem %s1168_s12, 4096  ;;  %s1416_s26 = int_to_ptr.vmem [resolvable:$true] %s863_s26 }
  0x1b   : > { %1023 = vmatpush3.bf16.msra.mxu0 %v1144_v3  ;;  %s1163_s10 = scalar_lea.vmem %s1416_s26, 2048  ;;  %p1170_p0 = scmp.lt.s32.totalorder %s1416_s26, %s1168_s12 }
  0x1c   : > { %1024 = vmatprep.subr.bf16.mxu0 %v1145_v5  ;;  %p1164_p11 = scmp.ne.s32.totalorder %s1416_s26, %s1163_s10  ;;  %p1171_p1 = scmp.lt.s32.totalorder %s1169_s19, %s1163_s10 }
  0x1d   : > { %1099 = vmatpush3.bf16.msra.mxu1 %v1160_v19 }
  0x1e   : > { %1072 = vmatprep.subr.bf16.mxu1 %v1161_v20  ;;  %p1165_p12 = pnand %p1164_p11, %p1303_p5  ;;  %p1172_p2 = por %p1171_p1, %p1170_p0 }
  0x1f   : > { %1025 = vmatpush3.bf16.msra.mxu0 %v1145_v5 }
  0x20   : > { %1026 = vmatprep.subr.bf16.mxu0 %v1146_v6  ;;  %p1166_p13 = pneg %p1165_p12 }
  0x22   : > { %p1173_p3 = pnand %p1172_p2, %p1166_p13 }
  0x23   : > { %1027 = vmatpush3.bf16.msra.mxu0 %v1146_v6 }
  0x24   : > { %1028 = vmatprep.subr.bf16.mxu0 %v1147_v8 }
  0x27   : > { %1029 = vmatpush3.bf16.msra.mxu0 %v1147_v8 }
  0x28   : > { %1030 = vmatprep.subr.bf16.mxu0 %v1148_v11 }
  0x2b   : > { %1031 = vmatpush3.bf16.msra.mxu0 %v1148_v11 }
  0x2c   : > { %1048 = vmatprep.subr.bf16.mxu0 %v1157_v7 }
  0x2e   : > { %1033 = vmatmul.mubr.bf16.vlgmr.msra.gmra.mrb[0].mxu0 %v1150_v12 }
  0x2f   : > { %1036 = vmatprep.mubr.bf16.mxu0 %v1151_v13  ;;  %1049 = vmatpush3.bf16.msra.mxu0 %v1157_v7 }
  0x30   : > { %1050 = vmatprep.subr.bf16.mxu0 %v1158_v9 }
  0x33   : > { %1051 = vmatpush3.bf16.msra.mxu0 %v1158_v9 }
  0x34   : > { %1052 = vmatprep.subr.bf16.mxu0 %v1159_v10 }
  0x36   : > { %1037 = vmatmul.mubr.bf16.gmra.mrb[4].mxu0 %v1152_v14 }
  0x37   : > { %1040 = vmatprep.mubr.bf16.mxu0 %v1153_v15  ;;  %1053 = vmatpush3.bf16.msra.mxu0 %v1159_v10  ;;  %v949_v15 = vld [vmem:[%s1468_s4] ss:$0 sm:$0xff] }
  0x38   : > { %1054 = vmatprep.subr.bf16.mxu0 %v1160_v19 }
  0x3b   : > { %1055 = vmatpush3.bf16.msra.mxu0 %v1160_v19 }
  0x3e   : > { %1041 = vmatmul.mubr.bf16.gmra.mrb[8].mxu0 %v1154_v16 }
  0x3f   : > { %1044 = vmatprep.mubr.bf16.mxu0 %v1155_v17 }
  0x46   : > { %1045 = vmatmul.mubr.bf16.gmra.mrb[12].mxu0 %v1156_v18 }
 0x101   : > { %v1034_v22 = vpop.f32.mrb[0].mxu0 }
 0x102   : > { %v432_v23 = vadd.f32 %v1034_v22, %v932_v21  ;;  %v423_v24 = vpop.f32.mrb[1].mxu0 }
 0x103   : > { %v424_v25 = vadd.f32 %v932_v21, %v423_v24  ;;  %v1035_v26 = vpop.f32.mrb[2].mxu0 }
 0x104   : > { %v435_v27 = vadd.f32 %v1035_v26, %v932_v21  ;;  %v426_v28 = vpop.f32.mrb[3].mxu0  ;;  %v488_v30 = vmax.f32 %v432_v23, 0.0 }
 0x105   : > { %v427_v29 = vadd.f32 %v932_v21, %v426_v28  ;;  %v486_v32 = vmax.f32 %v424_v25, 0.0 }
 0x106   : > { %v489_v31 = vmax.f32 %v435_v27, 0.0 }
 0x107   : > { %v487_v33 = vmax.f32 %v427_v29, 0.0 }
 0x108   : > { %v503_v34 = vpack.c.bf16 %v489_v31, %v488_v30 }
 0x109   : > { %v502_v35 = vpack.c.bf16 %v487_v33, %v486_v32  ;;  %v1038_v36 = vpop.f32.mrb[4].mxu0 }
 0x10a   : > { %v448_v37 = vadd.f32 %v1038_v36, %v932_v21  ;;  %v439_v38 = vpop.f32.mrb[5].mxu0 }
 0x10b   : > { %v440_v39 = vadd.f32 %v932_v21, %v439_v38  ;;  %v1039_v40 = vpop.f32.mrb[6].mxu0  ;;  %1056 = vmatprep.mubr.msk.bf16.mxu0 %vm549_vm0, %v502_v35 }
 0x10c   : > { %v451_v41 = vadd.f32 %v1039_v40, %v932_v21  ;;  %v442_v42 = vpop.f32.mrb[7].mxu0  ;;  %1057 = vmatmul.mubr.msk.bf16.vlgmr.msra.gmra.mrb[16].mxu0 %vm549_vm0, %v503_v34  ;;  %v492_v44 = vmax.f32 %v448_v37, 0.0 }
 0x10d   : > { %v443_v43 = vadd.f32 %v932_v21, %v442_v42  ;;  %v490_v46 = vmax.f32 %v440_v39, 0.0 }
 0x10e   : > { %v493_v45 = vmax.f32 %v451_v41, 0.0 }
 0x10f   : > { %v491_v47 = vmax.f32 %v443_v43, 0.0 }
 0x110   : > { %v505_v48 = vpack.c.bf16 %v493_v45, %v492_v44 }
 0x111   : > { %v1042_v49 = vpop.f32.mrb[8].mxu0  ;;  %v504_v50 = vpack.c.bf16 %v491_v47, %v490_v46 }
 0x112   : > { %v464_v51 = vadd.f32 %v1042_v49, %v932_v21  ;;  %v455_v52 = vpop.f32.mrb[9].mxu0 }
 0x113   : > { %v456_v54 = vadd.f32 %v932_v21, %v455_v52  ;;  %v1043_v55 = vpop.f32.mrb[10].mxu0  ;;  %1060 = vmatprep.mubr.msk.bf16.mxu1 %vm549_vm0, %v504_v50 }
 0x114   : > { %v467_v56 = vadd.f32 %v1043_v55, %v932_v21  ;;  %v458_v57 = vpop.f32.mrb[11].mxu0  ;;  %1061 = vmatmul.mubr.msk.bf16.vlgmr.msra.gmra.mrb[0].mxu1 %vm549_vm0, %v505_v48  ;;  %v496_v59 = vmax.f32 %v464_v51, 0.0 }
 0x115   : > { %v459_v58 = vadd.f32 %v932_v21, %v458_v57  ;;  %1073 = vmatpush3.bf16.msra.mxu1 %v1161_v20  ;;  %v494_v61 = vmax.f32 %v456_v54, 0.0 }
 0x116   : > { %v497_v60 = vmax.f32 %v467_v56, 0.0  ;;  %1074 = vmatprep.subr.bf16.mxu1 %v1162_v53 }
 0x117   : > { %v495_v62 = vmax.f32 %v459_v58, 0.0 }
 0x118   : > { %v507_v63 = vpack.c.bf16 %v497_v60, %v496_v59 }
 0x119   : > { %v506_v0 = vpack.c.bf16 %v495_v62, %v494_v61  ;;  %v1046_v1 = vpop.f32.mrb[12].mxu0  ;;  %1075 = vmatpush3.bf16.msra.mxu1 %v1162_v53 }
 0x11a   : > { %v480_v2 = vadd.f32 %v1046_v1, %v932_v21  ;;  %v471_v3 = vpop.f32.mrb[13].mxu0 }
 0x11b   : > { %v472_v4 = vadd.f32 %v932_v21, %v471_v3  ;;  %v1047_v5 = vpop.f32.mrb[14].mxu0  ;;  %1064 = vmatprep.mubr.msk.bf16.mxu1 %vm549_vm0, %v506_v0 }
 0x11c   : > { %v483_v6 = vadd.f32 %v1047_v5, %v932_v21  ;;  %v474_v7 = vpop.f32.mrb[15].mxu0  ;;  %1065 = vmatmul.mubr.msk.bf16.gmra.mrb[4].mxu1 %vm549_vm0, %v507_v63  ;;  %v500_v9 = vmax.f32 %v480_v2, 0.0 }
 0x11d   : > { %v475_v8 = vadd.f32 %v932_v21, %v474_v7  ;;  %v498_v11 = vmax.f32 %v472_v4, 0.0 }
 0x11e   : > { %v501_v10 = vmax.f32 %v483_v6, 0.0 }
 0x11f   : > { %v499_v12 = vmax.f32 %v475_v8, 0.0 }
 0x120   : > { %v509_v13 = vpack.c.bf16 %v501_v10, %v500_v9 }
 0x121   : > { %v508_v14 = vpack.c.bf16 %v499_v12, %v498_v11 }
 0x123   : > { %1068 = vmatprep.mubr.msk.bf16.mxu1 %vm549_vm0, %v508_v14 }
 0x124   : > { %1069 = vmatmul.mubr.msk.bf16.gmra.mrb[8].mxu1 %vm549_vm0, %v509_v13 }
 0x1df   : > { %v1058_v16 = vpop.f32.mrb[16].mxu0 }
 0x1e0   : > { %v617_v17 = vadd.f32 %v1058_v16, %v949_v15  ;;  %v608_v18 = vpop.f32.mrb[17].mxu0 }
 0x1e1   : > { %v609_v19 = vadd.f32 %v949_v15, %v608_v18  ;;  %v1059_v20 = vpop.f32.mrb[18].mxu0 }
 0x1e2   : > { %v620_v21 = vadd.f32 %v1059_v20, %v949_v15  ;;  %v611_v22 = vpop.f32.mrb[19].mxu0  ;;  %v673_v24 = vmax.f32 %v617_v17, 0.0 }
 0x1e3   : > { %v612_v23 = vadd.f32 %v949_v15, %v611_v22  ;;  %v671_v26 = vmax.f32 %v609_v19, 0.0 }
 0x1e4   : > { %v674_v25 = vmax.f32 %v620_v21, 0.0 }
 0x1e5   : > { %v672_v27 = vmax.f32 %v612_v23, 0.0 }
 0x1e6   : > { %v688_v28 = vpack.c.bf16 %v674_v25, %v673_v24 }
 0x1e7   : > { %v687_v29 = vpack.c.bf16 %v672_v27, %v671_v26  ;;  %v1062_v30 = vpop.f32.mrb[0].mxu1 }
 0x1e8   : > { %v633_v31 = vadd.f32 %v1062_v30, %v949_v15  ;;  %v624_v32 = vpop.f32.mrb[1].mxu1 }
 0x1e9   : > { %v625_v33 = vadd.f32 %v949_v15, %v624_v32  ;;  %v1063_v34 = vpop.f32.mrb[2].mxu1  ;;  %1076 = vmatprep.mubr.msk.bf16.mxu1 %vm711_vm1, %v687_v29 }
 0x1ea   : > { %v636_v35 = vadd.f32 %v1063_v34, %v949_v15  ;;  %v627_v36 = vpop.f32.mrb[3].mxu1  ;;  %1077 = vmatmul.mubr.msk.bf16.vlgmr.msra.gmra.mrb[12].mxu1 %vm711_vm1, %v688_v28  ;;  %v677_v38 = vmax.f32 %v633_v31, 0.0 }
 0x1eb   : > { %v628_v37 = vadd.f32 %v949_v15, %v627_v36  ;;  %v675_v40 = vmax.f32 %v625_v33, 0.0 }
 0x1ec   : > { %v678_v39 = vmax.f32 %v636_v35, 0.0 }
 0x1ed   : > { %v676_v41 = vmax.f32 %v628_v37, 0.0 }
 0x1ee   : > { %v690_v42 = vpack.c.bf16 %v678_v39, %v677_v38 }
 0x1ef   : > { %v689_v43 = vpack.c.bf16 %v676_v41, %v675_v40  ;;  %v1066_v44 = vpop.f32.mrb[4].mxu1 }
 0x1f0   : > { %v649_v45 = vadd.f32 %v1066_v44, %v949_v15  ;;  %v640_v46 = vpop.f32.mrb[5].mxu1 }
 0x1f1   : > { %v641_v47 = vadd.f32 %v949_v15, %v640_v46  ;;  %v1067_v48 = vpop.f32.mrb[6].mxu1  ;;  %1080 = vmatprep.mubr.msk.bf16.mxu1 %vm711_vm1, %v689_v43 }
 0x1f2   : > { %v652_v49 = vadd.f32 %v1067_v48, %v949_v15  ;;  %v643_v50 = vpop.f32.mrb[7].mxu1  ;;  %1081 = vmatmul.mubr.msk.bf16.gmra.mrb[16].mxu1 %vm711_vm1, %v690_v42  ;;  %v681_v52 = vmax.f32 %v649_v45, 0.0 }
 0x1f3   : > { %v644_v51 = vadd.f32 %v949_v15, %v643_v50  ;;  %v679_v54 = vmax.f32 %v641_v47, 0.0 }
 0x1f4   : > { %v682_v53 = vmax.f32 %v652_v49, 0.0 }
 0x1f5   : > { %v680_v55 = vmax.f32 %v644_v51, 0.0 }
 0x1f6   : > { %v692_v56 = vpack.c.bf16 %v682_v53, %v681_v52 }
 0x1f7   : > { %v691_v57 = vpack.c.bf16 %v680_v55, %v679_v54  ;;  %v1070_v58 = vpop.f32.mrb[8].mxu1 }
 0x1f8   : > { %v665_v59 = vadd.f32 %v1070_v58, %v949_v15  ;;  %v656_v60 = vpop.f32.mrb[9].mxu1 }
 0x1f9   : > { %v657_v61 = vadd.f32 %v949_v15, %v656_v60  ;;  %v1071_v62 = vpop.f32.mrb[10].mxu1  ;;  %1084 = vmatprep.mubr.msk.bf16.mxu1 %vm711_vm1, %v691_v57 }
 0x1fa   : > { %v668_v63 = vadd.f32 %v1071_v62, %v949_v15  ;;  %v659_v0 = vpop.f32.mrb[11].mxu1  ;;  %1085 = vmatmul.mubr.msk.bf16.gmra.mrb[20].mxu1 %vm711_vm1, %v692_v56  ;;  %v685_v2 = vmax.f32 %v665_v59, 0.0 }
 0x1fb   : > { %v660_v1 = vadd.f32 %v949_v15, %v659_v0  ;;  %v683_v4 = vmax.f32 %v657_v61, 0.0 }
 0x1fc   : > { %v686_v3 = vmax.f32 %v668_v63, 0.0 }
 0x1fd   : > { %v684_v5 = vmax.f32 %v660_v1, 0.0 }
 0x1fe   : > { %v694_v6 = vpack.c.bf16 %v686_v3, %v685_v2 }
 0x1ff   : > { %v693_v7 = vpack.c.bf16 %v684_v5, %v683_v4 }
 0x201   : > { %1088 = vmatprep.mubr.msk.bf16.mxu1 %vm711_vm1, %v693_v7 }
 0x202   : > { %1089 = vmatmul.mubr.msk.bf16.gmra.mrb[24].mxu1 %vm711_vm1, %v694_v6 }
 0x2bd   : > { %v1078_v8 = vpop.f32.mrb[12].mxu1 }
 0x2be   : > { %835 = vst [vmem:[%s1394_s18 + $0x10] sm:$0xff] %v1078_v8  ;;  %v770_v9 = vpop.f32.mrb[13].mxu1 }
 0x2bf   : > { %833 = vst [vmem:[%s1394_s18] sm:$0xff] %v770_v9  ;;  %v1079_v10 = vpop.f32.mrb[14].mxu1 }
 0x2c0   : > { %836 = vst [vmem:[%s1394_s18 + $0x18] sm:$0xff] %v1079_v10  ;;  %v773_v11 = vpop.f32.mrb[15].mxu1 }
 0x2c1   : > { %834 = vst [vmem:[%s1394_s18 + $0x8] sm:$0xff] %v773_v11 }
 0x2c5   : > { %v1082_v12 = vpop.f32.mrb[16].mxu1 }
 0x2c6   : > { %839 = vst [vmem:[%s1394_s18 + $0x30] sm:$0xff] %v1082_v12  ;;  %v786_v13 = vpop.f32.mrb[17].mxu1 }
 0x2c7   : > { %837 = vst [vmem:[%s1394_s18 + $0x20] sm:$0xff] %v786_v13  ;;  %v1083_v14 = vpop.f32.mrb[18].mxu1 }
 0x2c8   : > { %840 = vst [vmem:[%s1394_s18 + $0x38] sm:$0xff] %v1083_v14  ;;  %v789_v15 = vpop.f32.mrb[19].mxu1 }
 0x2c9   : > { %838 = vst [vmem:[%s1394_s18 + $0x28] sm:$0xff] %v789_v15 }
 0x2cd   : > { %v1086_v16 = vpop.f32.mrb[20].mxu1 }
 0x2ce   : > { %843 = vst [vmem:[%s1394_s18 + $0x50] sm:$0xff] %v1086_v16  ;;  %v802_v17 = vpop.f32.mrb[21].mxu1 }
 0x2cf   : > { %841 = vst [vmem:[%s1394_s18 + $0x40] sm:$0xff] %v802_v17  ;;  %v1087_v18 = vpop.f32.mrb[22].mxu1 }
 0x2d0   : > { %844 = vst [vmem:[%s1394_s18 + $0x58] sm:$0xff] %v1087_v18  ;;  %v805_v19 = vpop.f32.mrb[23].mxu1 }
 0x2d1   : > { %842 = vst [vmem:[%s1394_s18 + $0x48] sm:$0xff] %v805_v19 }
 0x2d5   : > { %v1090_v20 = vpop.f32.mrb[24].mxu1 }
 0x2d6   : > { %847 = vst [vmem:[%s1394_s18 + $0x70] sm:$0xff] %v1090_v20  ;;  %v818_v21 = vpop.f32.mrb[25].mxu1 }
 0x2d7   : > { %845 = vst [vmem:[%s1394_s18 + $0x60] sm:$0xff] %v818_v21  ;;  %v1091_v22 = vpop.f32.mrb[26].mxu1 }
 0x2d8   : > { %848 = vst [vmem:[%s1394_s18 + $0x78] sm:$0xff] %v1091_v22  ;;  %v821_v23 = vpop.f32.mrb[27].mxu1 }
 0x2d9   : > { %846 = vst [vmem:[%s1394_s18 + $0x68] sm:$0xff] %v821_v23 }
 0x2da   : > { %1176 = shalt.err (!%p1173_p3)
}
 0x2db   : > { %s1177_s13 = scalar_lea.hbm %s1414_s9, 2048  ;;  %s1181_s16 = scalar_lea.hbm %s1470_s6, 4096 }
 0x2dc   : > { %p1178_p4 = scmp.ne.s32.totalorder %s1414_s9, %s1177_s13  ;;  %p1182_p9 = scmp.lt.u32.totalorder %s1414_s9, %s1470_s6 }
 0x2dd   : > { %p1183_p10 = scmp.lt.u32.totalorder %s1181_s16, %s1177_s13  ;;  %p1185_p12 = scmp.lt.u32.totalorder %s1177_s13, %s1414_s9 }
 0x2de   : > { %p1179_p7 = pnand %p1178_p4, %p1303_p5 }
 0x2df   : > { %p1184_p11 = por %p1183_p10, %p1182_p9 }
 0x2e0   : > { %p1180_p8 = pneg %p1179_p7 }
 0x2e1   : > { %p1186_p13 = por %p1185_p12, %p1184_p11 }
 0x2e3   : > { %p1187_p0 = pnand %p1186_p13, %p1180_p8 }
 0x2e5   : > { %1190 = shalt.err (!%p1187_p0)
}
 0x2e6   : > { %s1228_s20 = smov 128   ;;  %s1229_s28 = smov 8  }
 0x2e7   : > { %1100 = dma.vmem_to_hbm [thread:$0]  (%p1303_p5), %s1416_s26, 2048, %s1414_s9, %s1423_s25, %s1228_s20, %s1228_s20, %s1229_s28  }
 0x2e8 PF: > { %p1106_p1 = scmp.ge.s32.totalorder %s1225_s24, 2  ;;  %s878_s29 = sand.u32 1, %s1213_s21  }
 0x2e9   : > { %s879_s10 = scalar_lea.sflag [#allocation3], %s878_s29 }
 0x2ea   : > { %p1103_p2 = pnand %p1106_p1, %p1307_p6 }
 0x2ec   : > { %1208 = dma.done.wait (!%p1103_p2), %s879_s10, 2048  }
 0x2ed   : > { %1210 = vsyncadd (!%p1103_p2), %s879_s10, 4294965248  ;;  %p16_p3 = scmp.ge.s32.totalorder %s1290_s27, 4   ;;  %s1473_s21 = smov %s1217_s22 }
 0x2ee   : > { %s1474_s22 = smov %s1221_s23  ;;  %s1475_s23 = smov %s1301_s30 }
 0x2ef   : > { %s1476_s24 = smov %s1290_s27  ;;  %18 = sbr.rel (!%p16_p3) target bundleno = 3 (0x3), region = 79 }
 0x2f6   :  { %884 = vsyncpa [#allocation3], 1 }
 0x2f7   :  { %886 = vsyncpa [#allocation3 + $0x1], 1 }

</bundles_post_ra>
